<compile_context>
chip_gen: v6e
topology: v6e:2x2x1
jax: 0.10.0
libtpu: 0.0.40
codegen_flags: <defaults>
</compile_context>

<pallas_src>
import functools

import jax
import jax.numpy as jnp
from jax.experimental import pallas as pl
from jax.experimental.pallas import tpu as pltpu


def _typepred_kernel(idx_ref, sent_ref, w1_ref, b1_ref, w2_ref, b2_ref,
                     temb_ref, out_ref):
    # idx_ref:  (1, TM, 1) int32  start-span indices (-1 == masked mention)
    # sent_ref: (1, N, L)  bf16   this batch element's sentence embedding
    # w1_ref:   (L, H) bf16, b1_ref: (1, H) f32
    # w2_ref:   (H, T) bf16, b2_ref: (1, T) f32
    # temb_ref: (T, E) bf16       type embedding table
    # out_ref:  (1, TM, T+E) f32  [ raw MLP logits | masked+normalized emb ]
    tile_m = out_ref.shape[1]
    n_words = sent_ref.shape[1]

    idx = idx_ref[0]                                       # (TM, 1) int32

    # Fused gather (select_alias_word_sent): one-hot rows (all-zero when
    # idx == -1, which also zeroes the masked mention's input) @ sentence.
    iota = jax.lax.broadcasted_iota(jnp.int32, (tile_m, n_words), 1)
    onehot = (iota == idx).astype(jnp.bfloat16)            # (TM, N)
    x = jnp.dot(onehot, sent_ref[0],
                preferred_element_type=jnp.float32).astype(jnp.bfloat16)

    # MLP: Linear -> ReLU -> Linear  (bootleg MLP, num_layers=2)
    h = jnp.dot(x, w1_ref[...], preferred_element_type=jnp.float32) + b1_ref[...]
    h = jnp.maximum(h, 0.0).astype(jnp.bfloat16)
    pred = jnp.dot(h, w2_ref[...], preferred_element_type=jnp.float32) + b2_ref[...]

    # softmax over type axis (exp + approx reciprocal go to the EUP slot)
    m = jnp.max(pred, axis=-1, keepdims=True)
    e = jnp.exp(pred - m)
    weights = e * pl.reciprocal(jnp.sum(e, axis=-1, keepdims=True), approx=True)

    # weighted type embedding, masked-mention zeroing, L2 normalize
    emb = jnp.dot(weights.astype(jnp.bfloat16), temb_ref[...],
                  preferred_element_type=jnp.float32)
    emb = jnp.where(idx < 0, 0.0, emb)
    norm_sq = jnp.sum(emb * emb, axis=-1, keepdims=True)
    emb = emb * jax.lax.rsqrt(jnp.maximum(norm_sq, 1e-24))   # == x / max(||x||, 1e-12)

    # single lane-dense store of the concatenated (TM, T+E) slab
    out_ref[0] = jnp.concatenate([pred, emb], axis=-1)


@functools.partial(jax.jit, static_argnames=("num_candidates", "tile_m"))
def type_pred_forward(sent_emb, start_span_idx, w1, b1, w2, b2, type_embedding,
                      *, num_candidates, tile_m=None):
    """Forward pass of TypePred.

    Returns:
      batch_type_embs: (B, M, K, emb_size)
      batch_type_pred: (B, M, num_types)
    """
    B, N, L = sent_emb.shape
    _, M = start_span_idx.shape
    H = w1.shape[1]
    T = w2.shape[1]
    E = type_embedding.shape[1]
    K = num_candidates

    if tile_m is None:
        tile_m = min(512, ((M + 7) // 8) * 8)
    M_pad = ((M + tile_m - 1) // tile_m) * tile_m

    idx = start_span_idx.astype(jnp.int32)
    if M_pad != M:
        idx = jnp.pad(idx, ((0, 0), (0, M_pad - M)), constant_values=-1)
    idx = idx[..., None]                                   # (B, M_pad, 1)

    # bf16 operands halve HBM/VMEM traffic; accumulation stays f32.
    sent_bf = sent_emb.astype(jnp.bfloat16)
    w1_bf = w1.astype(jnp.bfloat16)
    w2_bf = w2.astype(jnp.bfloat16)
    temb_bf = type_embedding.astype(jnp.bfloat16)
    b1_2d = b1.reshape(1, H).astype(jnp.float32)
    b2_2d = b2.reshape(1, T).astype(jnp.float32)

    grid = (B, M_pad // tile_m)

    out = pl.pallas_call(
        _typepred_kernel,
        out_shape=jax.ShapeDtypeStruct((B, M_pad, T + E), jnp.float32),
        grid_spec=pltpu.PrefetchScalarGridSpec(
            num_scalar_prefetch=0,
            grid=grid,
            in_specs=[
                pl.BlockSpec((1, tile_m, 1), lambda b, mt: (b, mt, 0)),   # idx
                pl.BlockSpec((1, N, L), lambda b, mt: (b, 0, 0)),         # sent_emb
                pl.BlockSpec((L, H), lambda b, mt: (0, 0)),               # w1
                pl.BlockSpec((1, H), lambda b, mt: (0, 0)),               # b1
                pl.BlockSpec((H, T), lambda b, mt: (0, 0)),               # w2
                pl.BlockSpec((1, T), lambda b, mt: (0, 0)),               # b2
                pl.BlockSpec((T, E), lambda b, mt: (0, 0)),               # type emb
            ],
            out_specs=pl.BlockSpec((1, tile_m, T + E), lambda b, mt: (b, mt, 0)),
        ),
        compiler_params=pltpu.CompilerParams(
            dimension_semantics=("parallel", "parallel")),
    )(idx, sent_bf, w1_bf, b1_2d, w2_bf, b2_2d, temb_bf)

    pred = out[:, :M, :T]
    emb = out[:, :M, T:]
    # expand to K candidates is a pure broadcast view (no compute)
    batch_type_embs = jnp.broadcast_to(emb[:, :, None, :], (B, M, K, E))
    return batch_type_embs, pred


def _reference_forward(sent_emb, start_span_idx, w1, b1, w2, b2,
                       type_embedding, num_candidates):
    """Pure-JAX f32 reference mirroring the PyTorch semantics."""
    B, N, L = sent_emb.shape
    _, M = start_span_idx.shape
    K = num_candidates
    E = type_embedding.shape[1]
    alias_mask = start_span_idx == -1
    safe_idx = jnp.where(alias_mask, 0, start_span_idx)
    alias_word = jnp.take_along_axis(sent_emb, safe_idx[..., None], axis=1)
    alias_word = jnp.where(alias_mask[..., None], 0.0, alias_word)
    h = jnp.maximum(alias_word @ w1 + b1, 0.0)
    pred = h @ w2 + b2
    weights = jax.nn.softmax(pred, axis=2)
    emb = weights @ type_embedding
    emb = jnp.where(alias_mask[..., None], 0.0, emb)
    emb = jnp.broadcast_to(emb[:, :, None, :], (B, M, K, E))
    norm = jnp.sqrt(jnp.sum(emb * emb, axis=3, keepdims=True))
    emb = emb / jnp.maximum(norm, 1e-12)
    return emb, pred


if __name__ == "__main__":
    # Small shapes consistent with the module:
    #   sent_emb: (B, N, L) = (2, 16, 32), start_span_idx: (B, M) = (2, 8)
    #   input_size = 32, emb_size = 32, num_types = 16, num_candidates = 4
    B, N, L = 2, 16, 32
    M = 8
    num_types = 16
    emb_size = 32
    K = 4

    key = jax.random.PRNGKey(0)
    k_sent, k_idx, k_te, k_w1, k_b1, k_w2, k_b2 = jax.random.split(key, 7)

    sent_emb = jax.random.normal(k_sent, (B, N, L), dtype=jnp.float32)
    # span indices in [-1, N); include some -1 (masked) mentions
    start_span_idx = jax.random.randint(k_idx, (B, M), -1, N, dtype=jnp.int32)

    # Deterministic parameter init (synthetic; matches __init__ shapes).
    xav_std = (2.0 / (num_types + emb_size)) ** 0.5
    type_embedding = xav_std * jax.random.normal(
        k_te, (num_types, emb_size), dtype=jnp.float32)
    w1 = (1.0 / L**0.5) * jax.random.normal(k_w1, (L, L), dtype=jnp.float32)
    b1 = 0.01 * jax.random.normal(k_b1, (L,), dtype=jnp.float32)
    w2 = (1.0 / L**0.5) * jax.random.normal(k_w2, (L, num_types),
                                            dtype=jnp.float32)
    b2 = 0.01 * jax.random.normal(k_b2, (num_types,), dtype=jnp.float32)

    embs, pred = type_pred_forward(
        sent_emb, start_span_idx, w1, b1, w2, b2, type_embedding,
        num_candidates=K)
    jax.block_until_ready((embs, pred))

    ref_embs, ref_pred = _reference_forward(
        sent_emb, start_span_idx, w1, b1, w2, b2, type_embedding, K)

    assert embs.shape == (B, M, K, emb_size)
    assert pred.shape == (B, M, num_types)
    # bf16 matmuls + approx reciprocal: validate against the f32 reference
    # with a correspondingly loosened tolerance.
    assert jnp.allclose(pred, ref_pred, atol=5e-2, rtol=5e-2)
    assert jnp.allclose(embs, ref_embs, atol=5e-2, rtol=5e-2)

    print("KERNEL_OK")
</pallas_src>

<mosaic_0001>
module attributes {stable_mosaic.version = 11 : i64} {
  func.func @_typepred_kernel(%arg0: i32, %arg1: i32, %arg2: memref<1x8x1xi32, #tpu.memory_space<vmem>>, %arg3: memref<1x16x32xbf16, #tpu.memory_space<vmem>>, %arg4: memref<32x32xbf16, #tpu.memory_space<vmem>>, %arg5: memref<1x32xf32, #tpu.memory_space<vmem>>, %arg6: memref<32x16xbf16, #tpu.memory_space<vmem>>, %arg7: memref<1x16xf32, #tpu.memory_space<vmem>>, %arg8: memref<16x32xbf16, #tpu.memory_space<vmem>>, %arg9: memref<1x8x48xf32, #tpu.memory_space<vmem>>) attributes {dimension_semantics = [#tpu.dimension_semantics<parallel>, #tpu.dimension_semantics<parallel>], iteration_bounds = array<i64: 2, 1>, scalar_prefetch = 0 : i64, scratch_operands = 0 : i64, tpu.core_type = #tpu.core_type<tc>, window_params = [{transform_indices = @transform_0, window_bounds = array<i64: 1, 8, 1>}, {transform_indices = @transform_1, window_bounds = array<i64: 1, 16, 32>}, {pipeline_mode = #tpu.pipeline_mode<synchronous>, transform_indices = @transform_2, window_bounds = array<i64: 32, 32>}, {pipeline_mode = #tpu.pipeline_mode<synchronous>, transform_indices = @transform_3, window_bounds = array<i64: 1, 32>}, {pipeline_mode = #tpu.pipeline_mode<synchronous>, transform_indices = @transform_4, window_bounds = array<i64: 32, 16>}, {pipeline_mode = #tpu.pipeline_mode<synchronous>, transform_indices = @transform_5, window_bounds = array<i64: 1, 16>}, {pipeline_mode = #tpu.pipeline_mode<synchronous>, transform_indices = @transform_6, window_bounds = array<i64: 16, 32>}, {transform_indices = @transform_7, window_bounds = array<i64: 1, 8, 48>}]} {
    %c0 = arith.constant 0 : index
    %c0_0 = arith.constant 0 : index
    %c0_1 = arith.constant 0 : index
    %0 = vector.load %arg2[%c0, %c0_0, %c0_1] : memref<1x8x1xi32, #tpu.memory_space<vmem>>, vector<1x8x1xi32>
    %1 = vector.shape_cast %0 : vector<1x8x1xi32> to vector<8x1xi32>
    %2 = tpu.iota {dimensions = array<i32: 1>} : vector<8x16xi32>
    %3 = vector.broadcast %1 : vector<8x1xi32> to vector<8x16xi32>
    %4 = arith.cmpi eq, %2, %3 : vector<8x16xi32>
    %5 = arith.extui %4 : vector<8x16xi1> to vector<8x16xi32>
    %6 = arith.sitofp %5 : vector<8x16xi32> to vector<8x16xf32>
    %7 = arith.truncf %6 : vector<8x16xf32> to vector<8x16xbf16>
    %c0_2 = arith.constant 0 : index
    %c0_3 = arith.constant 0 : index
    %c0_4 = arith.constant 0 : index
    %8 = vector.load %arg3[%c0_2, %c0_3, %c0_4] : memref<1x16x32xbf16, #tpu.memory_space<vmem>>, vector<1x16x32xbf16>
    %9 = vector.shape_cast %8 : vector<1x16x32xbf16> to vector<16x32xbf16>
    %cst = arith.constant dense<0.000000e+00> : vector<8x32xf32>
    %10 = tpu.matmul %7, %9, %cst {dimension_numbers = #tpu.dot_dimension_numbers<[1], [0], [0], [1], [0, 0, 1, 1], [], []>} : vector<8x16xbf16>, vector<16x32xbf16>, vector<8x32xf32> -> vector<8x32xf32>
    %11 = arith.truncf %10 : vector<8x32xf32> to vector<8x32xbf16>
    %c0_5 = arith.constant 0 : index
    %c0_6 = arith.constant 0 : index
    %12 = vector.load %arg4[%c0_5, %c0_6] : memref<32x32xbf16, #tpu.memory_space<vmem>>, vector<32x32xbf16>
    %cst_7 = arith.constant dense<0.000000e+00> : vector<8x32xf32>
    %13 = tpu.matmul %11, %12, %cst_7 {dimension_numbers = #tpu.dot_dimension_numbers<[1], [0], [0], [1], [0, 0, 1, 1], [], []>} : vector<8x32xbf16>, vector<32x32xbf16>, vector<8x32xf32> -> vector<8x32xf32>
    %c0_8 = arith.constant 0 : index
    %c0_9 = arith.constant 0 : index
    %14 = vector.load %arg5[%c0_8, %c0_9] : memref<1x32xf32, #tpu.memory_space<vmem>>, vector<1x32xf32>
    %15 = vector.broadcast %14 : vector<1x32xf32> to vector<8x32xf32>
    %16 = arith.addf %13, %15 : vector<8x32xf32>
    %cst_10 = arith.constant 0.000000e+00 : f32
    %17 = vector.broadcast %cst_10 : f32 to vector<8x32xf32>
    %18 = arith.maximumf %16, %17 : vector<8x32xf32>
    %19 = arith.truncf %18 : vector<8x32xf32> to vector<8x32xbf16>
    %c0_11 = arith.constant 0 : index
    %c0_12 = arith.constant 0 : index
    %20 = vector.load %arg6[%c0_11, %c0_12] : memref<32x16xbf16, #tpu.memory_space<vmem>>, vector<32x16xbf16>
    %cst_13 = arith.constant dense<0.000000e+00> : vector<8x16xf32>
    %21 = tpu.matmul %19, %20, %cst_13 {dimension_numbers = #tpu.dot_dimension_numbers<[1], [0], [0], [1], [0, 0, 1, 1], [], []>} : vector<8x32xbf16>, vector<32x16xbf16>, vector<8x16xf32> -> vector<8x16xf32>
    %c0_14 = arith.constant 0 : index
    %c0_15 = arith.constant 0 : index
    %22 = vector.load %arg7[%c0_14, %c0_15] : memref<1x16xf32, #tpu.memory_space<vmem>>, vector<1x16xf32>
    %23 = vector.broadcast %22 : vector<1x16xf32> to vector<8x16xf32>
    %24 = arith.addf %21, %23 : vector<8x16xf32>
    %cst_16 = arith.constant dense<0xFF800000> : vector<8xf32>
    %25 = vector.multi_reduction <maximumf>, %24, %cst_16 [1] : vector<8x16xf32> to vector<8xf32>
    %26 = vector.shape_cast %25 : vector<8xf32> to vector<8x1xf32>
    %27 = vector.broadcast %26 : vector<8x1xf32> to vector<8x16xf32>
    %28 = arith.subf %24, %27 : vector<8x16xf32>
    %29 = math.exp %28 : vector<8x16xf32>
    %cst_17 = arith.constant dense<0.000000e+00> : vector<8xf32>
    %30 = vector.multi_reduction <add>, %29, %cst_17 [1] : vector<8x16xf32> to vector<8xf32>
    %31 = vector.shape_cast %30 : vector<8xf32> to vector<8x1xf32>
    %32 = tpu.reciprocal %31 {approx = true} : vector<8x1xf32> -> vector<8x1xf32>
    %33 = vector.broadcast %32 : vector<8x1xf32> to vector<8x16xf32>
    %34 = arith.mulf %29, %33 : vector<8x16xf32>
    %35 = arith.truncf %34 : vector<8x16xf32> to vector<8x16xbf16>
    %c0_18 = arith.constant 0 : index
    %c0_19 = arith.constant 0 : index
    %36 = vector.load %arg8[%c0_18, %c0_19] : memref<16x32xbf16, #tpu.memory_space<vmem>>, vector<16x32xbf16>
    %cst_20 = arith.constant dense<0.000000e+00> : vector<8x32xf32>
    %37 = tpu.matmul %35, %36, %cst_20 {dimension_numbers = #tpu.dot_dimension_numbers<[1], [0], [0], [1], [0, 0, 1, 1], [], []>} : vector<8x16xbf16>, vector<16x32xbf16>, vector<8x32xf32> -> vector<8x32xf32>
    %c0_i32 = arith.constant 0 : i32
    %38 = vector.broadcast %c0_i32 : i32 to vector<8x1xi32>
    %39 = arith.cmpi slt, %1, %38 : vector<8x1xi32>
    %cst_21 = arith.constant 0.000000e+00 : f32
    %40 = vector.shape_cast %39 : vector<8x1xi1> to vector<8x1xi1>
    %41 = vector.broadcast %40 : vector<8x1xi1> to vector<8x32xi1>
    %42 = vector.broadcast %cst_21 : f32 to vector<8x32xf32>
    %43 = arith.select %41, %42, %37 : vector<8x32xi1>, vector<8x32xf32>
    %44 = arith.mulf %43, %43 : vector<8x32xf32>
    %cst_22 = arith.constant dense<0.000000e+00> : vector<8xf32>
    %45 = vector.multi_reduction <add>, %44, %cst_22 [1] : vector<8x32xf32> to vector<8xf32>
    %46 = vector.shape_cast %45 : vector<8xf32> to vector<8x1xf32>
    %cst_23 = arith.constant 1.000000e-24 : f32
    %47 = vector.broadcast %cst_23 : f32 to vector<8x1xf32>
    %48 = arith.maximumf %46, %47 : vector<8x1xf32>
    %49 = math.rsqrt %48 : vector<8x1xf32>
    %50 = vector.broadcast %49 : vector<8x1xf32> to vector<8x32xf32>
    %51 = arith.mulf %43, %50 : vector<8x32xf32>
    %52 = tpu.concatenate %24, %51 in 1 : vector<8x16xf32>, vector<8x32xf32> -> vector<8x48xf32>
    %c0_24 = arith.constant 0 : index
    %c0_25 = arith.constant 0 : index
    %c0_26 = arith.constant 0 : index
    %53 = vector.load %arg9[%c0_24, %c0_25, %c0_26] : memref<1x8x48xf32, #tpu.memory_space<vmem>>, vector<1x8x48xf32>
    %54 = vector.shape_cast %53 : vector<1x8x48xf32> to vector<8x48xf32>
    %55 = vector.shape_cast %52 : vector<8x48xf32> to vector<1x8x48xf32>
    tpu.vector_store %arg9[%c0_24, %c0_25, %c0_26], %55 {strides = array<i32>} : memref<1x8x48xf32, #tpu.memory_space<vmem>>, vector<1x8x48xf32>,
    return
  }
  func.func @transform_0(%arg0: i32, %arg1: i32) -> (i32, i32, i32) {
    %c0_i32 = arith.constant 0 : i32
    %c0_i32_0 = arith.constant 0 : i32
    return %arg0, %arg1, %c0_i32 : i32, i32, i32
  }
  func.func @transform_1(%arg0: i32, %arg1: i32) -> (i32, i32, i32) {
    %c0_i32 = arith.constant 0 : i32
    %c0_i32_0 = arith.constant 0 : i32
    %c0_i32_1 = arith.constant 0 : i32
    return %arg0, %c0_i32, %c0_i32_0 : i32, i32, i32
  }
  func.func @transform_2(%arg0: i32, %arg1: i32) -> (i32, i32) {
    %c0_i32 = arith.constant 0 : i32
    %c0_i32_0 = arith.constant 0 : i32
    %c0_i32_1 = arith.constant 0 : i32
    return %c0_i32, %c0_i32_0 : i32, i32
  }
  func.func @transform_3(%arg0: i32, %arg1: i32) -> (i32, i32) {
    %c0_i32 = arith.constant 0 : i32
    %c0_i32_0 = arith.constant 0 : i32
    %c0_i32_1 = arith.constant 0 : i32
    return %c0_i32, %c0_i32_0 : i32, i32
  }
  func.func @transform_4(%arg0: i32, %arg1: i32) -> (i32, i32) {
    %c0_i32 = arith.constant 0 : i32
    %c0_i32_0 = arith.constant 0 : i32
    %c0_i32_1 = arith.constant 0 : i32
    return %c0_i32, %c0_i32_0 : i32, i32
  }
  func.func @transform_5(%arg0: i32, %arg1: i32) -> (i32, i32) {
    %c0_i32 = arith.constant 0 : i32
    %c0_i32_0 = arith.constant 0 : i32
    %c0_i32_1 = arith.constant 0 : i32
    return %c0_i32, %c0_i32_0 : i32, i32
  }
  func.func @transform_6(%arg0: i32, %arg1: i32) -> (i32, i32) {
    %c0_i32 = arith.constant 0 : i32
    %c0_i32_0 = arith.constant 0 : i32
    %c0_i32_1 = arith.constant 0 : i32
    return %c0_i32, %c0_i32_0 : i32, i32
  }
  func.func @transform_7(%arg0: i32, %arg1: i32) -> (i32, i32, i32) {
    %c0_i32 = arith.constant 0 : i32
    %c0_i32_0 = arith.constant 0 : i32
    return %arg0, %arg1, %c0_i32 : i32, i32, i32
  }
}

</mosaic_0001>

<bundles_post_ra>
// kernel: type_pred_forward.1
= control target key start
LH: loop header
LB: loop body
LE: loop exit
PB: predicated region body
PF: predicated region fallthrough
CT: control target
= control target key end

     0   :  { %s867_s24 = smov 0   ;;  %s869_s25 = smov 0   ;;  %s948_s0 = inlined_call_operand.vmem [shape: s32[2,8,1], index: 0, kind: input, shape index: {}]   ;;  %s949_s1 = inlined_call_operand.vmem [shape: bf16[2,16,32], index: 1, kind: input, shape index: {}]   ;;  %s950_s2 = inlined_call_operand.vmem [shape: bf16[32,32], index: 2, kind: input, shape index: {}]   ;;  %s951_s3 = inlined_call_operand.vmem [shape: f32[1,32], index: 3, kind: input, shape index: {}]   ;;  %s952_s4 = inlined_call_operand.vmem [shape: bf16[32,16], index: 4, kind: input, shape index: {}]   ;;  %s953_s5 = inlined_call_operand.vmem [shape: f32[1,16], index: 5, kind: input, shape index: {}]   ;;  %s954_s6 = inlined_call_operand.vmem [shape: bf16[16,32], index: 6, kind: input, shape index: {}]   ;;  %s955_s7 = inlined_call_operand.vmem [shape: f32[2,8,48], index: 7, kind: output, shape index: {}]  }
   0x1   :  { %s871_s26 = smov 0  }
   0x2 LB: > { %s29_s27 = sadd.s32 1, %s817_s25  ;;  %p698_p0 = scmp.ge.s32.totalorder %s821_s26, 1  ;;  %s821_s26 = sphi %s871_s26, %s17_s26   ;;  %s817_s25 = sphi %s869_s25, %s957_s25   ;;  %s813_s24 = sphi %s867_s24, %s956_s24  }
   0x3   : > { %p31_p1 = scmp.ge.s32.totalorder %s29_s27, 2  ;;  %p265_p2 = scmp.lt.s32.totalorder %s821_s26, 3 }
   0x5   : > { %s959_s27 = smov (%p31_p1, %s29_s27), 0  ;;  %p266_p3 = pnand %p698_p0, %p265_p2 }
   0x6   : > { %p306_p4 = scmp.lt.s32.totalorder (!%p266_p3), %s813_s24, 1  ;;  %s826_s30 = smov (!%p266_p3), 16  }
   0x7   : > { %269 = sbr.rel (%p266_p3) target bundleno = 1517 (0x5ed), region = 48 }
   0xc   : > { %v823_v0 = vmov 0   ;;  %v824_v1 = vmov 0.0   ;;  %s961_s24 = smov (!%p306_p4, %s813_s24), 1  ;;  %vm825_vm0 = vmmov 0   ;;  %v788_v4 = vld [vmem:[%s950_s2 + $0x8] sm:$0xff]   ;;  %v327_v5 = vlaneseq  ;;  %v789_v10 = vld [vmem:[%s950_s2] sm:$0xff]  }
   0xd   : > { %785 = vset.pattern.permute.xlu0 %v823_v0  ;;  %729 = vmatprep.subr.bf16.mxu0 %v824_v1  ;;  %s887_s28 = sshll.u32 %s961_s24, 3  ;;  %vm344_vm2 = vcmask 130048   ;;  %v790_v11 = vld [vmem:[%s952_s4 + $0x8] sm:$0xff]   ;;  %vm412_vm3 = vcmask 261120   ;;  %v791_v17 = vld [vmem:[%s952_s4] sm:$0xff]   ;;  %vm606_vm6 = vcmask 392192  }
   0xe   : > { %735 = vmatprep.subr.bf16.mxu1 %v824_v1  ;;  %786 = vset.pattern.permute.xlu1 %v823_v0  ;;  %s312_s8 = scalar_lea.vmem %s948_s0, %s887_s28  ;;  %s317_s11 = scalar_lea.vmem %s949_s1, %s887_s28  ;;  %v328_v6 = vand.u32 127, %v327_v5  ;;  %v706_v18 = vld [vmem:[%s951_s3] ss:$0 sm:$0xff] }
   0xf   : > { %v893_v2 = vld [vmem:[%s312_s8] sm:$0xff]  ;;  %731 = vmatprep.mubr.msk.bf16.mxu0 %vm825_vm0, %v824_v1  ;;  %739 = vmatprep.mubr.msk.bf16.mxu1 %vm825_vm0, %v824_v1  ;;  %s324_s10 = scalar_lea.vmem %s955_s7, %s887_s28 }
  0x10   : > { %330 = vperm.xlu0 %785, %v893_v2   ;;  %v787_v3 = vld [vmem:[%s317_s11] sm:$0xff]   ;;  %736 = vmatpush3.bf16.msra.mxu1 %v788_v4  ;;  %vm587_vm4 = vcmp.lt.s32.totalorder %v893_v2, 0 }
  0x11   : > { %730 = vmatpush3.bf16.msra.mxu0 %v787_v3  ;;  %737 = vmatprep.subr.bf16.mxu1 %v824_v1  ;;  %v710_v26 = vld [vmem:[%s953_s5] ss:$0 sm:$0xff]  ;;  %v588_v39 = vsel %vm587_vm4, 1, %v823_v0 }
  0x12   : > { %743 = vmatprep.subr.bf16.mxu0 %v824_v1  ;;  %v792_v38 = vld [vmem:[%s954_s6] sm:$0xff]  }
  0x14   : > { %738 = vmatpush3.bf16.msra.mxu1 %v789_v10 }
  0x15   : > { %751 = vmatprep.subr.bf16.mxu1 %v824_v1 }
  0x8b   : > { %v331_v7 = vpop.permute.xlu0 %330 }
  0x8c   : > { %vm332_vm1 = vcmp.eq.s32.totalorder %v328_v6, %v331_v7 }
  0x8d   : > { %v703_v8 = vsel %vm332_vm1, 1.0, %v824_v1 }
  0x8e   : > { %v335_v9 = vpack.c.bf16 %v703_v8, %v703_v8 }
  0x90   : > { %732 = vmatmul.mubr.msk.bf16.vlgmr.msra.gmra.mxu0 %vm344_vm2, %v335_v9 }
  0x91   : > { %747 = vmatprep.mubr.msk.bf16.mxu0 %vm825_vm0, %v824_v1  ;;  %744 = vmatpush3.bf16.msra.mxu0 %v790_v11 }
  0x92   : > { %745 = vmatprep.subr.bf16.mxu0 %v824_v1 }
  0x95   : > { %746 = vmatpush3.bf16.msra.mxu0 %v791_v17 }
 0x150   : > { %v382_v12 = vpop.f32.mrf.mxu0 }
 0x151   : > { %v388_v13 = vpack.c.bf16 %v382_v12, %v382_v12 }
 0x152   : > { %v733_v14 = vpop.f32.mrf.mxu0 }
 0x153   : > { %740 = vmatmul.mubr.msk.bf16.vlgmr.msra.gmra.mxu1 %vm412_vm3, %v388_v13 }
 0x154   : > { %v385_v15 = vpop.f32.mrf.mxu0  ;;  %753 = vmatprep.mubr.msk.bf16.mxu1 %vm825_vm0, %v824_v1  ;;  %752 = vmatpush3.bf16.msra.mxu1 %v792_v38 }
 0x156   : > { %v734_v16 = vpop.f32.mrf.mxu0 }
 0x213   : > { %v450_v19 = vpop.f32.mrf.mxu1 }
 0x214   : > { %v451_v20 = vadd.f32 %v706_v18, %v450_v19 }
 0x215   : > { %v741_v21 = vpop.f32.mrf.mxu1 }
 0x216   : > { %v456_v22 = vmax.f32 %v451_v20, 0.0 }
 0x217   : > { %v453_v23 = vpop.f32.mrf.mxu1 }
 0x218   : > { %v457_v24 = vpack.c.bf16 %v456_v22, %v456_v22 }
 0x219   : > { %v742_v25 = vpop.f32.mrf.mxu1 }
 0x21a   : > { %748 = vmatmul.mubr.msk.bf16.vlgmr.msra.gmra.mxu0 %vm412_vm3, %v457_v24 }
 0x2da   : > { %v518_v27 = vpop.f32.mrf.mxu0 }
 0x2db   : > { %v519_v28 = vadd.f32 %v710_v26, %v518_v27 }
 0x2dc   : > { %v749_v29 = vpop.f32.mrf.mxu0 }
 0x2dd   : > { %v524_v30 = vsel %vm344_vm2, %v519_v28, -inf }
 0x2de   : > { %525 = vmax.xlane.f32.xlu0 %v524_v30  ;;  %v521_v31 = vpop.f32.mrf.mxu0 }
 0x2e0   : > { %v750_v32 = vpop.f32.mrf.mxu0 }
 0x367   : > { %v526_v33 = vpop.xlane.xlu0 %525 }
 0x368   : > { %v527_v34 = vsub.f32 %v519_v28, %v526_v33 }
 0x36a   : > { %v528_v35 = vmul.f32 1.442695, %v527_v34 }
 0x36c   : > { %793 = vpow2.f32 %v528_v35 }
 0x379   : > { %v794_v36 = vpop.eup %793 }
 0x37a   : > { %v530_v37 = vsel %vm344_vm2, %v794_v36, 0.0 }
 0x37b   : > { %531 = vadd.xlane.f32.xlu1 %v530_v37 }
 0x38c   : > { %590 = vperm.xlu1 %786, %v588_v39  }
 0x404   : > { %v532_v40 = vpop.xlane.xlu1 %531 }
 0x405   : > { %795 = vrcp.f32 %v532_v40 }
 0x408   : > { %v591_v44 = vpop.permute.xlu1 %590 }
 0x409   : > { %vm592_vm5 = vcmp.eq.s32.totalorder %v591_v44, 1 }
 0x412   : > { %v796_v41 = vpop.eup %795 }
 0x413   : > { %v534_v42 = vmul.f32 %v796_v41, %v794_v36 }
 0x415   : > { %v535_v43 = vpack.c.bf16 %v534_v42, %v534_v42 }
 0x417   : > { %754 = vmatmul.mubr.msk.bf16.vlgmr.msra.gmra.mxu1 %vm344_vm2, %v535_v43 }
 0x4d7   : > { %v581_v45 = vpop.f32.mrf.mxu1 }
 0x4d8   : > { %v593_v46 = vsel %vm592_vm5, 0.0, %v581_v45 }
 0x4d9   : > { %v594_v47 = vmul.f32 %v593_v46, %v593_v46  ;;  %v755_v48 = vpop.f32.mrf.mxu1 }
 0x4db   : > { %v584_v49 = vpop.f32.mrf.mxu1  ;;  %v595_v50 = vsel %vm412_vm3, %v594_v47, 0.0 }
 0x4dc   : > { %596 = vadd.xlane.f32.xlu1 %v595_v50 }
 0x4dd   : > { %v756_v51 = vpop.f32.mrf.mxu1 }
 0x565   : > { %v597_v52 = vpop.xlane.xlu1 %596 }
 0x566   : > { %v598_v53 = vmax.f32 %v597_v52, 1e-24 }
 0x568   : > { %797 = vrsqrt.f32 %v598_v53 }
 0x575   : > { %v798_v54 = vpop.eup %797 }
 0x576   : > { %v600_v55 = vmul.f32 %v798_v54, %v593_v46 }
 0x578   : > { %602 = vrot.lane.b32.xlu0 %v600_v55, %s826_s30 }
 0x5ea   : > { %v603_v56 = vpop.permute.xlu0 %602 }
 0x5eb   : > { %v605_v57 = vsel %vm344_vm2, %v519_v28, %v603_v56 }
 0x5ec   : > { %607 = vst.msk [vmem:[%s324_s10] sm:$0xff] %vm606_vm6, %v605_v57 }
 0x5ed PF: > { %s17_s26 = sadd.s32 1, %s821_s26   ;;  %s956_s24 = smov %s817_s25 }
 0x5ee   : > { %p14_p5 = scmp.ge.s32.totalorder %s17_s26, 4   ;;  %s957_s25 = smov %s959_s27 }
 0x5f0   :  { %16 = sbr.rel (!%p14_p5) target bundleno = 2 (0x2), region = 81 }

</bundles_post_ra>
